<compile_context>
chip_gen: v7x
topology: tpu7x:2x2x1
jax: 0.10.0
libtpu: 0.0.40
codegen_flags: <defaults>
</compile_context>

<pallas_src>
import jax
import jax.numpy as jnp
from jax.experimental import pallas as pl
from jax.experimental.pallas import tpu as pltpu

LANE = 128
SUBLANE = 8


def _round_up(n, m):
    return ((n + m - 1) // m) * m


def mlp_kernel(x_ref, w0_ref, b0_ref, w1_ref, b1_ref, wp_ref, bp_ref, o_ref):
    # Hoist loads once (JAX does not CSE broadcast_in_dim).
    b0 = b0_ref[...]          # (1, Hp) f32
    b1 = b1_ref[...]          # (1, Hp) f32 -- reused by both lin_1 applications
    w1 = w1_ref[...]          # (Hp, Hp) mxu dtype
    wp_row = wp_ref[...]      # (1, Hp) f32
    bp = bp_ref[0, 0]         # scalar f32 from SMEM

    mxu_dtype = w0_ref.dtype

    # lin_0 + ReLU (operands in MXU dtype, f32 accumulation)
    h = jnp.dot(x_ref[...].astype(mxu_dtype), w0_ref[...],
                preferred_element_type=jnp.float32)
    h = jnp.maximum(h + b0, 0.0)

    # dropout(p=0.1): identity in eval/inference mode
    # TODO(synk): training-mode dropout (pltpu.prng_seed / prng_random_bits mask
    # with 1/(1-p) scaling) is not implemented.

    # lin_1 + ReLU, applied twice with the same weights (matches the PyTorch forward)
    h = jnp.maximum(
        jnp.dot(h.astype(mxu_dtype), w1, preferred_element_type=jnp.float32) + b1, 0.0)
    h = jnp.maximum(
        jnp.dot(h.astype(mxu_dtype), w1, preferred_element_type=jnp.float32) + b1, 0.0)

    # predict (out_features = 1) + ReLU: N=1 would waste the MXU, so VPU multiply +
    # XLU lane reduce instead. Output block is (TB, 1): tiny writeback.
    out = jnp.sum(h * wp_row, axis=-1, keepdims=True) + bp    # (TB, 1)
    o_ref[...] = jnp.maximum(out, 0.0)


def _pick_batch_tile(B):
    """Batch rows per grid step: big enough to amortize the ~0.35us/step overhead,
    but keeping >=2 grid steps for large B (v7x megacore)."""
    if B < 256:
        return _round_up(B, SUBLANE)          # single small tile
    tb = 128 * max(1, (B // 2) // 128)        # ~>=2 tiles, multiple of 128
    return min(tb, 1024)


def mlp_forward(x, w0, b0, w1, b1, wp, bp, *, mxu_dtype=jnp.float32):
    """x: (B, F) f32; w0: (F, H); b0: (1, H); w1: (H, H); b1: (1, H); wp: (H, 1); bp: (1, 1).
    Weights are stored pre-transposed as [in, out], so the kernel computes x @ W."""
    B, F = x.shape
    H = w0.shape[1]

    Fp = _round_up(F, SUBLANE)   # sublane-align only; no 128-lane padding of x
    Hp = _round_up(H, LANE)      # hidden dim padded once (weights are tiny & resident)
    TB = _pick_batch_tile(B)
    Bp = _round_up(B, TB)
    num_tiles = Bp // TB

    xp = x if (B == Bp and F == Fp) else jnp.pad(x, ((0, Bp - B), (0, Fp - F)))
    w0p = jnp.pad(w0, ((0, Fp - F), (0, Hp - H))).astype(mxu_dtype)
    b0p = jnp.pad(b0, ((0, 0), (0, Hp - H)))
    w1p = jnp.pad(w1, ((0, Hp - H), (0, Hp - H))).astype(mxu_dtype)
    b1p = jnp.pad(b1, ((0, 0), (0, Hp - H)))
    wpr = jnp.pad(wp.T, ((0, 0), (0, Hp - H)))    # predict weight as (1, Hp) f32 row

    resident = lambda shape: pl.BlockSpec(shape, lambda i: (0, 0))  # stays in VMEM

    out_padded = pl.pallas_call(
        mlp_kernel,
        out_shape=jax.ShapeDtypeStruct((Bp, 1), jnp.float32),
        grid=(num_tiles,),
        in_specs=[
            pl.BlockSpec((TB, Fp), lambda i: (i, 0)),   # x tile, pipelined over batch
            resident((Fp, Hp)),                         # w0
            resident((1, Hp)),                          # b0
            resident((Hp, Hp)),                         # w1
            resident((1, Hp)),                          # b1
            resident((1, Hp)),                          # wp row
            pl.BlockSpec(memory_space=pltpu.MemorySpace.SMEM),   # bp scalar
        ],
        out_specs=pl.BlockSpec((TB, 1), lambda i: (i, 0)),
        compiler_params=pltpu.CompilerParams(
            # Batch tiles are independent -> parallel (splits across the 2 TCs on v7x;
            # no-op on v5e/v6e). VMEM stays well under default scoped limits even at
            # TB=1024, so no vmem_limit_bytes override is needed.
            dimension_semantics=("parallel",),
        ),
    )(xp, w0p, b0p, w1p, b1p, wpr, bp)

    return out_padded if B == Bp else out_padded[:B]


def init_linear(key, fan_in, fan_out):
    # PyTorch nn.Linear default init: U(-1/sqrt(fan_in), 1/sqrt(fan_in))
    kw, kb = jax.random.split(key)
    bound = 1.0 / jnp.sqrt(float(fan_in))
    # stored as [in, out] (transposed vs. PyTorch's [out, in])
    w = jax.random.uniform(kw, (fan_in, fan_out), jnp.float32, -bound, bound)
    b = jax.random.uniform(kb, (1, fan_out), jnp.float32, -bound, bound)
    return w, b


if __name__ == "__main__":
    relu = lambda v: jnp.maximum(v, 0.0)

    def reference(x, w0, b0, w1, b1, wp, bp):
        h = relu(x @ w0 + b0)
        h = relu(h @ w1 + b1)
        h = relu(h @ w1 + b1)
        return relu(h @ wp + bp)

    key = jax.random.PRNGKey(0)
    k_x, k0, k1, kp, k_x2 = jax.random.split(key, 5)

    B, n_features, n_hidden = 8, 16, 32
    x = jax.random.normal(k_x, (B, n_features), jnp.float32)
    w0, b0 = init_linear(k0, n_features, n_hidden)
    w1, b1 = init_linear(k1, n_hidden, n_hidden)
    wp, bp = init_linear(kp, n_hidden, 1)

    # f32 path (matches PyTorch eval-mode forward), single small tile.
    out = mlp_forward(x, w0, b0, w1, b1, wp, bp, mxu_dtype=jnp.float32)
    jax.block_until_ready(out)
    ref = reference(x, w0, b0, w1, b1, wp, bp)
    assert out.shape == (B, 1)
    assert jnp.allclose(out, ref, atol=2e-5, rtol=1e-4), (
        float(jnp.max(jnp.abs(out - ref)))
    )

    # Multi-tile grid + batch padding + bf16 MXU operands (v6e/v7x fast path).
    B2 = 272
    x2 = jax.random.normal(k_x2, (B2, n_features), jnp.float32)
    out2 = mlp_forward(x2, w0, b0, w1, b1, wp, bp, mxu_dtype=jnp.bfloat16)
    jax.block_until_ready(out2)
    ref2 = reference(x2, w0, b0, w1, b1, wp, bp)
    assert out2.shape == (B2, 1)
    assert jnp.allclose(out2, ref2, atol=2e-2, rtol=2e-2), (
        float(jnp.max(jnp.abs(out2 - ref2)))
    )

    print("KERNEL_OK")
</pallas_src>

<mosaic_0001>
module attributes {stable_mosaic.version = 11 : i64} {
  func.func @mlp_kernel(%arg0: i32, %arg1: memref<8x16xf32, #tpu.memory_space<vmem>>, %arg2: memref<16x128xf32, #tpu.memory_space<vmem>>, %arg3: memref<1x128xf32, #tpu.memory_space<vmem>>, %arg4: memref<128x128xf32, #tpu.memory_space<vmem>>, %arg5: memref<1x128xf32, #tpu.memory_space<vmem>>, %arg6: memref<1x128xf32, #tpu.memory_space<vmem>>, %arg7: memref<1x1xf32, #tpu.memory_space<smem>>, %arg8: memref<8x1xf32, #tpu.memory_space<vmem>>) attributes {dimension_semantics = [#tpu.dimension_semantics<parallel>], iteration_bounds = array<i64: 1>, scalar_prefetch = 0 : i64, scratch_operands = 0 : i64, tpu.core_type = #tpu.core_type<tc>, window_params = [{transform_indices = @transform_0, window_bounds = array<i64: 8, 16>}, {pipeline_mode = #tpu.pipeline_mode<synchronous>, transform_indices = @transform_1, window_bounds = array<i64: 16, 128>}, {pipeline_mode = #tpu.pipeline_mode<synchronous>, transform_indices = @transform_2, window_bounds = array<i64: 1, 128>}, {pipeline_mode = #tpu.pipeline_mode<synchronous>, transform_indices = @transform_3, window_bounds = array<i64: 128, 128>}, {pipeline_mode = #tpu.pipeline_mode<synchronous>, transform_indices = @transform_4, window_bounds = array<i64: 1, 128>}, {pipeline_mode = #tpu.pipeline_mode<synchronous>, transform_indices = @transform_5, window_bounds = array<i64: 1, 128>}, {transform_indices = @transform_6, window_bounds = array<i64: 1, 1>}, {transform_indices = @transform_7, window_bounds = array<i64: 8, 1>}]} {
    %c0 = arith.constant 0 : index
    %c0_0 = arith.constant 0 : index
    %0 = vector.load %arg3[%c0, %c0_0] : memref<1x128xf32, #tpu.memory_space<vmem>>, vector<1x128xf32>
    %c0_1 = arith.constant 0 : index
    %c0_2 = arith.constant 0 : index
    %1 = vector.load %arg5[%c0_1, %c0_2] : memref<1x128xf32, #tpu.memory_space<vmem>>, vector<1x128xf32>
    %c0_3 = arith.constant 0 : index
    %c0_4 = arith.constant 0 : index
    %2 = vector.load %arg4[%c0_3, %c0_4] : memref<128x128xf32, #tpu.memory_space<vmem>>, vector<128x128xf32>
    %c0_5 = arith.constant 0 : index
    %c0_6 = arith.constant 0 : index
    %3 = vector.load %arg6[%c0_5, %c0_6] : memref<1x128xf32, #tpu.memory_space<vmem>>, vector<1x128xf32>
    %c0_7 = arith.constant 0 : index
    %c0_8 = arith.constant 0 : index
    %4 = memref.load %arg7[%c0_7, %c0_8] : memref<1x1xf32, #tpu.memory_space<smem>>
    %c0_9 = arith.constant 0 : index
    %c0_10 = arith.constant 0 : index
    %5 = vector.load %arg1[%c0_9, %c0_10] : memref<8x16xf32, #tpu.memory_space<vmem>>, vector<8x16xf32>
    %c0_11 = arith.constant 0 : index
    %c0_12 = arith.constant 0 : index
    %6 = vector.load %arg2[%c0_11, %c0_12] : memref<16x128xf32, #tpu.memory_space<vmem>>, vector<16x128xf32>
    %cst = arith.constant dense<0.000000e+00> : vector<8x128xf32>
    %7 = tpu.matmul %5, %6, %cst {dimension_numbers = #tpu.dot_dimension_numbers<[1], [0], [0], [1], [0, 0, 1, 1], [], []>} : vector<8x16xf32>, vector<16x128xf32>, vector<8x128xf32> -> vector<8x128xf32>
    %8 = vector.broadcast %0 : vector<1x128xf32> to vector<8x128xf32>
    %9 = arith.addf %7, %8 : vector<8x128xf32>
    %cst_13 = arith.constant 0.000000e+00 : f32
    %10 = vector.broadcast %cst_13 : f32 to vector<8x128xf32>
    %11 = arith.maximumf %9, %10 : vector<8x128xf32>
    %cst_14 = arith.constant dense<0.000000e+00> : vector<8x128xf32>
    %12 = tpu.matmul %11, %2, %cst_14 {dimension_numbers = #tpu.dot_dimension_numbers<[1], [0], [0], [1], [0, 0, 1, 1], [], []>} : vector<8x128xf32>, vector<128x128xf32>, vector<8x128xf32> -> vector<8x128xf32>
    %13 = vector.broadcast %1 : vector<1x128xf32> to vector<8x128xf32>
    %14 = arith.addf %12, %13 : vector<8x128xf32>
    %cst_15 = arith.constant 0.000000e+00 : f32
    %15 = vector.broadcast %cst_15 : f32 to vector<8x128xf32>
    %16 = arith.maximumf %14, %15 : vector<8x128xf32>
    %cst_16 = arith.constant dense<0.000000e+00> : vector<8x128xf32>
    %17 = tpu.matmul %16, %2, %cst_16 {dimension_numbers = #tpu.dot_dimension_numbers<[1], [0], [0], [1], [0, 0, 1, 1], [], []>} : vector<8x128xf32>, vector<128x128xf32>, vector<8x128xf32> -> vector<8x128xf32>
    %18 = vector.broadcast %1 : vector<1x128xf32> to vector<8x128xf32>
    %19 = arith.addf %17, %18 : vector<8x128xf32>
    %cst_17 = arith.constant 0.000000e+00 : f32
    %20 = vector.broadcast %cst_17 : f32 to vector<8x128xf32>
    %21 = arith.maximumf %19, %20 : vector<8x128xf32>
    %22 = vector.broadcast %3 : vector<1x128xf32> to vector<8x128xf32>
    %23 = arith.mulf %21, %22 : vector<8x128xf32>
    %cst_18 = arith.constant dense<0.000000e+00> : vector<8xf32>
    %24 = vector.multi_reduction <add>, %23, %cst_18 [1] : vector<8x128xf32> to vector<8xf32>
    %25 = vector.shape_cast %24 : vector<8xf32> to vector<8x1xf32>
    %26 = vector.broadcast %4 : f32 to vector<8x1xf32>
    %27 = arith.addf %25, %26 : vector<8x1xf32>
    %cst_19 = arith.constant 0.000000e+00 : f32
    %28 = vector.broadcast %cst_19 : f32 to vector<8x1xf32>
    %29 = arith.maximumf %27, %28 : vector<8x1xf32>
    %c0_20 = arith.constant 0 : index
    %c0_21 = arith.constant 0 : index
    %30 = vector.load %arg8[%c0_20, %c0_21] : memref<8x1xf32, #tpu.memory_space<vmem>>, vector<8x1xf32>
    tpu.vector_store %arg8[%c0_20, %c0_21], %29 {strides = array<i32>} : memref<8x1xf32, #tpu.memory_space<vmem>>, vector<8x1xf32>,
    return
  }
  func.func @transform_0(%arg0: i32) -> (i32, i32) {
    %c0_i32 = arith.constant 0 : i32
    %c0_i32_0 = arith.constant 0 : i32
    return %arg0, %c0_i32 : i32, i32
  }
  func.func @transform_1(%arg0: i32) -> (i32, i32) {
    %c0_i32 = arith.constant 0 : i32
    %c0_i32_0 = arith.constant 0 : i32
    %c0_i32_1 = arith.constant 0 : i32
    return %c0_i32, %c0_i32_0 : i32, i32
  }
  func.func @transform_2(%arg0: i32) -> (i32, i32) {
    %c0_i32 = arith.constant 0 : i32
    %c0_i32_0 = arith.constant 0 : i32
    %c0_i32_1 = arith.constant 0 : i32
    return %c0_i32, %c0_i32_0 : i32, i32
  }
  func.func @transform_3(%arg0: i32) -> (i32, i32) {
    %c0_i32 = arith.constant 0 : i32
    %c0_i32_0 = arith.constant 0 : i32
    %c0_i32_1 = arith.constant 0 : i32
    return %c0_i32, %c0_i32_0 : i32, i32
  }
  func.func @transform_4(%arg0: i32) -> (i32, i32) {
    %c0_i32 = arith.constant 0 : i32
    %c0_i32_0 = arith.constant 0 : i32
    %c0_i32_1 = arith.constant 0 : i32
    return %c0_i32, %c0_i32_0 : i32, i32
  }
  func.func @transform_5(%arg0: i32) -> (i32, i32) {
    %c0_i32 = arith.constant 0 : i32
    %c0_i32_0 = arith.constant 0 : i32
    %c0_i32_1 = arith.constant 0 : i32
    return %c0_i32, %c0_i32_0 : i32, i32
  }
  func.func @transform_6(%arg0: i32) -> (i32, i32) {
    %c0_i32 = arith.constant 0 : i32
    %c0_i32_0 = arith.constant 0 : i32
    %c0_i32_1 = arith.constant 0 : i32
    return %c0_i32, %c0_i32_0 : i32, i32
  }
  func.func @transform_7(%arg0: i32) -> (i32, i32) {
    %c0_i32 = arith.constant 0 : i32
    %c0_i32_0 = arith.constant 0 : i32
    return %arg0, %c0_i32 : i32, i32
  }
}

</mosaic_0001>

<bundles_post_ra>
// kernel: tpu_custom_call.1
= control target key start
LH: loop header
LB: loop body
LE: loop exit
PB: predicated region body
PF: predicated region fallthrough
CT: control target
= control target key end

     0   :  { %13 = vsyncpa [#allocation4], 0  ;;  %s710_s0 = inlined_call_operand.hbm [shape: f32[8,16], index: 0, kind: input, shape index: {}]   ;;  %s711_s1 = inlined_call_operand.hbm [shape: f32[16,128], index: 1, kind: input, shape index: {}]   ;;  %s712_s2 = inlined_call_operand.vmem [shape: f32[1,128], index: 2, kind: input, shape index: {}]   ;;  %s713_s3 = inlined_call_operand.hbm [shape: f32[128,128], index: 3, kind: input, shape index: {}]   ;;  %s714_s4 = inlined_call_operand.vmem [shape: f32[1,128], index: 4, kind: input, shape index: {}]   ;;  %s715_s5 = inlined_call_operand.vmem [shape: f32[1,128], index: 5, kind: input, shape index: {}]   ;;  %s716_s6 = inlined_call_operand.<no memory space> [shape: f32[1,1], index: 6, kind: input, shape index: {}]   ;;  %s717_s7 = inlined_call_operand.vmem [shape: f32[8,1], index: 7, kind: output, shape index: {}]  }
   0x1   :  { %14 = vsyncpa [#allocation6], 0  ;;  %s585_s24 = smov [#allocation5]   ;;  %s515_s28 = scalar_lea.hbm %s711_s1, 256 }
   0x2   :  { %s30_s25 = sshll.u32 %s585_s24, 4  ;;  %p516_p0 = scmp.ne.s32.totalorder %s711_s1, %s515_s28  ;;  %s31_s25 = int_to_ptr.vmem [resolvable:$true] %s30_s25 }
   0x3   :  { %p519_p1 = scmp.lt.u32.totalorder %s515_s28, %s711_s1 }
   0x5   :  { %p521_p2 = pnand %p519_p1, %p516_p0 }
   0x7   :  { %524 = shalt.err (!%p521_p2)
}
   0x8   :  { %s525_s10 = scalar_lea.vmem %s31_s25, 256  ;;  %p530_p4 = scmp.lt.s32.totalorder %s31_s25, %s31_s25 }
   0x9   :  { %p526_p3 = scmp.ne.s32.totalorder %s31_s25, %s525_s10  ;;  %p531_p5 = scmp.lt.s32.totalorder %s525_s10, %s525_s10 }
   0xb   :  { %p532_p6 = por %p531_p5, %p530_p4 }
   0xd   :  { %p533_p7 = pnand %p532_p6, %p526_p3 }
   0xf   :  { %536 = shalt.err (!%p533_p7)
}
  0x10   :  { %s586_s11 = smov 128   ;;  %s587_s12 = smov 8  }
  0x11   :  { %36 = dma.hbm_to_vmem [thread:$0]  %s711_s1, 256, %s31_s25, [#allocation6], %s586_s11, %s586_s11, %s587_s12  }
  0x12   :  { %s588_s15 = smov [#allocation3]   ;;  %s589_s17 = smov [#allocation7]  }
  0x13   :  { %s21_s16 = sshll.u32 %s588_s15, 4  ;;  %s44_s18 = sshll.u32 %s589_s17, 4  ;;  %s22_s16 = int_to_ptr.vmem [resolvable:$true] %s21_s16  ;;  %s45_s18 = int_to_ptr.vmem [resolvable:$true] %s44_s18 }
  0x14   :  { %s537_s21 = scalar_lea.hbm %s710_s0, 128 }
  0x15   :  { %p538_p8 = scmp.ne.s32.totalorder %s710_s0, %s537_s21  ;;  %p541_p9 = scmp.lt.u32.totalorder %s537_s21, %s710_s0 }
  0x17   :  { %p543_p10 = pnand %p541_p9, %p538_p8 }
  0x19   :  { %546 = shalt.err (!%p543_p10)
}
  0x1a   :  { %s547_s1 = scalar_lea.vmem %s22_s16, 128  ;;  %p552_p12 = scmp.lt.s32.totalorder %s22_s16, %s22_s16 }
  0x1b   :  { %p548_p11 = scmp.ne.s32.totalorder %s22_s16, %s547_s1  ;;  %p553_p13 = scmp.lt.s32.totalorder %s547_s1, %s547_s1 }
  0x1d   :  { %p554_p0 = por %p553_p13, %p552_p12 }
  0x1f   :  { %p555_p1 = pnand %p554_p0, %p548_p11 }
  0x21   :  { %558 = shalt.err (!%p555_p1)
}
  0x22   :  { %24 = dma.hbm_to_vmem [thread:$0]  %s710_s0, 128, %s22_s16, [#allocation4]  }
  0x23   :  { %s559_s30 = scalar_lea.hbm %s713_s3, 2048 }
  0x24   :  { %p560_p2 = scmp.ne.s32.totalorder %s713_s3, %s559_s30  ;;  %p563_p3 = scmp.lt.u32.totalorder %s559_s30, %s713_s3 }
  0x26   :  { %p565_p4 = pnand %p563_p3, %p560_p2 }
  0x28   :  { %568 = shalt.err (!%p565_p4)
}
  0x29   :  { %s569_s14 = scalar_lea.vmem %s45_s18, 2048  ;;  %p574_p6 = scmp.lt.s32.totalorder %s45_s18, %s45_s18 }
  0x2a   :  { %p570_p5 = scmp.ne.s32.totalorder %s45_s18, %s569_s14  ;;  %p575_p7 = scmp.lt.s32.totalorder %s569_s14, %s569_s14 }
  0x2c   :  { %p576_p8 = por %p575_p7, %p574_p6 }
  0x2e   :  { %p577_p9 = pnand %p576_p8, %p570_p5 }
  0x30   :  { %580 = shalt.err (!%p577_p9)
}
  0x31   :  { %50 = dma.hbm_to_vmem [thread:$0]  %s713_s3, 2048, %s45_s18, [#allocation6], %s586_s11, %s586_s11, %s587_s12  }
  0x32   :  { %581 = dma.done.wait [#allocation4], 128  }
  0x33   :  { %582 = vsyncadd [#allocation4], 4294967168 }
  0x34   :  { %583 = dma.done.wait [#allocation6], 2304  }
  0x35   :  { %584 = vsyncadd [#allocation6], 4294964992  ;;  %v590_v0 = vmov 0.0|0.0   ;;  %vm591_vm0 = vmmov 0   ;;  %v592_v1 = vmov 0.0   ;;  %v87_v2 = vld [vmem:[#allocation5] sm:$0xff]  ;;  %v327_v46 = vstv %s716_s6 }
  0x36   :  { %456 = vmatprep.subr.bf16.mxu0 %v590_v0  ;;  %383 = vmatprep.mubr.msk.f32.mxu0 %vm591_vm0, %v592_v1  ;;  %v88_v3 = vld [vmem:[#allocation5 + $0x8] sm:$0xff]  ;;  %v68_v5 = vld [vmem:[#allocation7] sm:$0xff]  ;;  %v69_v6 = vld [vmem:[#allocation7 + $0x8] sm:$0xff]  ;;  %vm95_vm1 = vcmask 130048   ;;  %vm330_vm2 = vcmask 7168  }
  0x37   :  { %459 = vmatprep.subr.bf16.mxu1 %v590_v0  ;;  %418 = vmatprep.mubr.msk.f32.mxu1 %vm591_vm0, %v592_v1  ;;  %v457_v4 = vpack.c.bf16 %v88_v3, %v87_v2  ;;  %v70_v7 = vld [vmem:[#allocation7 + $0x10] sm:$0xff]  ;;  %v460_v8 = vpack.c.bf16 %v69_v6, %v68_v5  ;;  %v71_v9 = vld [vmem:[#allocation7 + $0x18] sm:$0xff]  ;;  %v86_v10 = vld [vmem:[#allocation3] sm:$0xff] }
  0x38   :  { %v463_v11 = vpack.c.bf16 %v71_v9, %v70_v7  ;;  %v72_v12 = vld [vmem:[#allocation7 + $0x20] sm:$0xff]  ;;  %v73_v13 = vld [vmem:[#allocation7 + $0x28] sm:$0xff]  ;;  %v74_v15 = vld [vmem:[#allocation7 + $0x30] sm:$0xff] }
  0x39   :  { %458 = vmatpush3.bf16.msra.mxu0 %v457_v4  ;;  %461 = vmatpush3.bf16.msra.mxu1 %v460_v8  ;;  %v466_v14 = vpack.c.bf16 %v73_v13, %v72_v12  ;;  %v75_v16 = vld [vmem:[#allocation7 + $0x38] sm:$0xff]  ;;  %v76_v18 = vld [vmem:[#allocation7 + $0x40] sm:$0xff]  ;;  %v77_v19 = vld [vmem:[#allocation7 + $0x48] sm:$0xff] }
  0x3a   :  { %483 = vmatprep.subr.bf16.mxu0 %v590_v0  ;;  %462 = vmatprep.subr.bf16.mxu1 %v590_v0  ;;  %v469_v17 = vpack.c.bf16 %v75_v16, %v74_v15  ;;  %v472_v20 = vpack.c.bf16 %v77_v19, %v76_v18  ;;  %v78_v21 = vld [vmem:[#allocation7 + $0x50] sm:$0xff]  ;;  %v79_v22 = vld [vmem:[#allocation7 + $0x58] sm:$0xff]  ;;  %v80_v24 = vld [vmem:[#allocation7 + $0x60] sm:$0xff] }
  0x3b   :  { %v475_v23 = vpack.c.bf16 %v79_v22, %v78_v21  ;;  %v81_v25 = vld [vmem:[#allocation7 + $0x68] sm:$0xff]  ;;  %v82_v27 = vld [vmem:[#allocation7 + $0x70] sm:$0xff]  ;;  %v83_v28 = vld [vmem:[#allocation7 + $0x78] sm:$0xff] }
  0x3c   :  { %384 = vmatmul.mubr.msk.f32.vlgmr.msra.gmra.mrb[0].mxu0 %vm95_vm1, %v86_v10  ;;  %v478_v26 = vpack.c.bf16 %v81_v25, %v80_v24  ;;  %v481_v29 = vpack.c.bf16 %v83_v28, %v82_v27  ;;  %v338_v30 = vld [vmem:[%s712_s2] ss:$0 sm:$0xff] }
  0x3d   :  { %485 = vmatpush3.bf16.msra.mxu0 %v460_v8  ;;  %453 = vmatprep.mubr.msk.f32.mxu0 %vm591_vm0, %v592_v1  ;;  %v340_v35 = vld [vmem:[%s714_s4] ss:$0 sm:$0xff] }
  0x3e   :  { %464 = vmatpush3.bf16.msra.mxu1 %v463_v11  ;;  %486 = vmatprep.subr.bf16.mxu0 %v590_v0  ;;  %v341_v43 = vld [vmem:[%s715_s5] ss:$0 sm:$0xff] }
  0x3f   :  { %465 = vmatprep.subr.bf16.mxu1 %v590_v0 }
  0x41   :  { %488 = vmatpush3.bf16.msra.mxu0 %v463_v11 }
  0x42   :  { %467 = vmatpush3.bf16.msra.mxu1 %v466_v14  ;;  %489 = vmatprep.subr.bf16.mxu0 %v590_v0 }
  0x43   :  { %468 = vmatprep.subr.bf16.mxu1 %v590_v0 }
  0x45   :  { %491 = vmatpush3.bf16.msra.mxu0 %v466_v14 }
  0x46   :  { %470 = vmatpush3.bf16.msra.mxu1 %v469_v17  ;;  %492 = vmatprep.subr.bf16.mxu0 %v590_v0 }
  0x47   :  { %471 = vmatprep.subr.bf16.mxu1 %v590_v0 }
  0x49   :  { %494 = vmatpush3.bf16.msra.mxu0 %v469_v17 }
  0x4a   :  { %473 = vmatpush3.bf16.msra.mxu1 %v472_v20  ;;  %495 = vmatprep.subr.bf16.mxu0 %v590_v0 }
  0x4b   :  { %474 = vmatprep.subr.bf16.mxu1 %v590_v0 }
  0x4d   :  { %497 = vmatpush3.bf16.msra.mxu0 %v472_v20 }
  0x4e   :  { %476 = vmatpush3.bf16.msra.mxu1 %v475_v23  ;;  %498 = vmatprep.subr.bf16.mxu0 %v590_v0 }
  0x4f   :  { %477 = vmatprep.subr.bf16.mxu1 %v590_v0 }
  0x51   :  { %500 = vmatpush3.bf16.msra.mxu0 %v475_v23 }
  0x52   :  { %479 = vmatpush3.bf16.msra.mxu1 %v478_v26  ;;  %501 = vmatprep.subr.bf16.mxu0 %v590_v0 }
  0x53   :  { %480 = vmatprep.subr.bf16.mxu1 %v590_v0 }
  0x55   :  { %503 = vmatpush3.bf16.msra.mxu0 %v478_v26 }
  0x56   :  { %504 = vmatprep.subr.bf16.mxu0 %v590_v0  ;;  %482 = vmatpush3.bf16.msra.mxu1 %v481_v29 }
  0x59   :  { %506 = vmatpush3.bf16.msra.mxu0 %v481_v29 }
 0x10f   :  { %v165_v31 = vpop.f32.mrb[0].mxu0 }
 0x110   :  { %v166_v32 = vadd.f32 %v338_v30, %v165_v31  ;;  %v385_v33 = vpop.f32.mrb[1].mxu0 }
 0x112   :  { %v169_v34 = vmax.f32 %v166_v32, 0.0 }
 0x114   :  { %419 = vmatmul.mubr.f32.vlgmr.msra.gmra.mrb[0].mxu1 %v169_v34 }
 0x1e7   :  { %v242_v36 = vpop.f32.mrb[0].mxu1 }
 0x1e8   :  { %v243_v37 = vadd.f32 %v340_v35, %v242_v36  ;;  %v420_v38 = vpop.f32.mrb[1].mxu1 }
 0x1ea   :  { %v246_v39 = vmax.f32 %v243_v37, 0.0 }
 0x1ec   :  { %454 = vmatmul.mubr.f32.vlgmr.msra.gmra.mrb[2].mxu0 %v246_v39 }
 0x2bf   :  { %v313_v40 = vpop.f32.mrb[2].mxu0 }
 0x2c0   :  { %v314_v41 = vadd.f32 %v340_v35, %v313_v40  ;;  %v455_v42 = vpop.f32.mrb[3].mxu0 }
 0x2c2   :  { %v317_v44 = vmax.f32 %v314_v41, 0.0 }
 0x2c4   :  { %v324_v45 = vmul.f32 %v341_v43, %v317_v44 }
 0x2c6   :  { %325 = vadd.xlane.f32.xlu0 %v324_v45 }
 0x353   :  { %v326_v47 = vpop.xlane.xlu0 %325 }
 0x354   :  { %v328_v48 = vadd.f32 %v327_v46, %v326_v47 }
 0x356   :  { %v329_v49 = vmax.f32 %v328_v48, 0.0 }
 0x358   :  { %331 = vst.msk [vmem:[%s717_s7] sm:$0xff] %vm330_vm2, %v329_v49 }
 0x359   :  { %336 = vsyncpa [#allocation4], 1 }
 0x35a   :  { %337 = vsyncpa [#allocation6], 1 }

</bundles_post_ra>
